<compile_context>
chip_gen: v7x
topology: tpu7x:2x2x1
jax: 0.10.0
libtpu: 0.0.40
codegen_flags: <defaults>
</compile_context>

<pallas_src>
import jax
import jax.numpy as jnp
from jax.experimental import pallas as pl
from jax.experimental.pallas import tpu as pltpu


def _make_head_kernel(x_ref, w_ref, b_ref, o_ref, acc_ref):
    # x_ref: (tm, tk), w_ref: (tk, tn), b_ref: (1, tn), o_ref: (tm, tn)
    k = pl.program_id(2)

    @pl.when(k == 0)
    def _init():
        acc_ref[...] = jnp.zeros_like(acc_ref)

    acc_ref[...] += jnp.dot(
        x_ref[...], w_ref[...], preferred_element_type=jnp.float32
    )

    @pl.when(k == pl.num_programs(2) - 1)
    def _finalize():
        out = acc_ref[...] + b_ref[...].astype(jnp.float32)  # (1, tn) broadcast
        o_ref[...] = out.astype(o_ref.dtype)


def _round_up(x: int, n: int) -> int:
    return ((x + n - 1) // n) * n


def _choose_tile(dim: int, target: int, min_tile: int):
    """Return (tile, padded_dim) for one GEMM dimension.

    * dim <= target            -> full-extent block (always legal), no padding.
    * an exact divisor exists  -> largest halved-from-target divisor >= min_tile.
    * otherwise                -> largest candidate whose zero-pad waste <= 12.5%
                                  (falls back to min_tile).
    """
    if dim <= target:
        return dim, dim
    t = target
    while t >= min_tile:
        if dim % t == 0:
            return t, dim
        t //= 2
    t = target
    while t > min_tile:
        if (_round_up(dim, t) - dim) * 8 <= dim:
            break
        t //= 2
    return t, _round_up(dim, t)


def _chip_preset():
    kind = ""
    try:
        kind = jax.devices()[0].device_kind.lower()
    except Exception:
        pass
    if ("v5 lite" in kind) or ("v5lite" in kind) or ("v5e" in kind):
        # 197 TF/s vs 0.82 TB/s: 512x512 output tile is already compute-bound.
        return dict(tm=512, tn=512, tk=512, vmem_cap=100 << 20, cores=1)
    if "v7" in kind:
        # 64 MiB physical VMEM per TC, 2 TCs/chip sharing the grid.
        return dict(tm=1024, tn=1024, tk=512, vmem_cap=48 << 20, cores=2)
    # v6e (and other chips with 128 MiB VMEM) / default.
    return dict(tm=1024, tn=2048, tk=512, vmem_cap=100 << 20, cores=1)


def _footprint(tm, tn, tk, x_bytes, w_bytes, out_bytes, w_bufs):
    """Estimated VMEM footprint: double-buffered x/out, w_bufs-deep weight,
    f32 accumulator scratch, bias."""
    return (2 * tm * tk * x_bytes
            + w_bufs * tk * tn * w_bytes
            + 2 * tm * tn * out_bytes
            + tm * tn * 4
            + 2 * tn * 4)


def _weight_spec(tk, tn, weight_bufs):
    idx = lambda i, j, k: (k, j)
    if weight_bufs > 2 and hasattr(pl, "Buffered"):
        try:
            return pl.BlockSpec((tk, tn), idx,
                                pipeline_mode=pl.Buffered(weight_bufs))
        except Exception:  # older jax without pipeline_mode: plain double-buffer
            pass
    return pl.BlockSpec((tk, tn), idx)


def make_head_forward(x, weight_t, bias, num_heads, d_head,
                      *, tm=None, tn=None, tk=None):
    """MakeHead forward.

    x:        (..., d_model)
    weight_t: (d_model, d_out)   -- PyTorch Linear weight, transposed ONCE at load time
    bias:     (d_out,)
    returns:  (..., num_heads, d_head)
    """
    d_model = x.shape[-1]
    d_out = num_heads * d_head
    assert weight_t.shape == (d_model, d_out)
    assert bias.shape == (d_out,)

    lead = x.shape[:-1]
    m = 1
    for s in lead:
        m *= s

    x2 = x.reshape(m, d_model)
    b2 = bias.reshape(1, d_out)

    preset = _chip_preset()
    tm_t = tm if tm is not None else preset["tm"]
    tn_t = tn if tn is not None else preset["tn"]
    tk_t = tk if tk is not None else preset["tk"]
    vmem_cap = preset["vmem_cap"]

    x_bytes = jnp.dtype(x.dtype).itemsize
    w_bytes = jnp.dtype(weight_t.dtype).itemsize
    out_bytes = x_bytes

    tm_, m_pad = _choose_tile(m, tm_t, 256)
    tn_, n_pad = _choose_tile(d_out, tn_t, 256)
    tk_, k_pad = _choose_tile(d_model, tk_t, 256)

    # Decode / small-m fast path: one M tile -> purely weight-bandwidth bound.
    # Use the full d_out as the N tile if it fits VMEM, so x is read once and
    # the store is a single lane-dense slab.
    if m_pad == tm_ and d_out > tn_:
        if _footprint(tm_, d_out, tk_, x_bytes, w_bytes, out_bytes, 2) <= (vmem_cap * 3) // 4:
            tn_, n_pad = d_out, d_out

    # v7x: keep >= 2 parallel tiles so both TensorCores get work.
    if preset["cores"] >= 2 and (m_pad // tm_) * (n_pad // tn_) < 2 and tn_ % 256 == 0:
        tn_ //= 2

    grid_m, grid_n, grid_k = m_pad // tm_, n_pad // tn_, k_pad // tk_

    # Deeper weight pipeline when the weight is streamed many times and never
    # revisited (single M tile); keeps the DMA queue full in the mem-bound case.
    weight_bufs = 2
    if grid_m == 1 and grid_n * grid_k >= 3:
        if _footprint(tm_, tn_, tk_, x_bytes, w_bytes, out_bytes, 3) <= vmem_cap:
            weight_bufs = 3

    # Zero-pad ragged dims: padded K columns/rows are zero (no effect on the dot);
    # padded M rows / N cols are sliced off the output.
    if (m_pad, k_pad) != (m, d_model):
        x2 = jnp.pad(x2, ((0, m_pad - m), (0, k_pad - d_model)))
    if (k_pad, n_pad) != (d_model, d_out):
        weight_t = jnp.pad(weight_t, ((0, k_pad - d_model), (0, n_pad - d_out)))
    if n_pad != d_out:
        b2 = jnp.pad(b2, ((0, 0), (0, n_pad - d_out)))

    # Scoped-VMEM limit: actual footprint + 25% headroom, at least the default
    # scoped limit, capped per generation (v7x only has 64 MiB physical).
    needed = _footprint(tm_, tn_, tk_, x_bytes, w_bytes, out_bytes, weight_bufs)
    vmem_limit = int(min(vmem_cap, max((needed * 5) // 4, 32 << 20)))

    # Honest traffic estimate: weight re-streamed once per M tile, x once per N tile.
    cost = pl.CostEstimate(
        flops=2 * m_pad * k_pad * n_pad,
        bytes_accessed=(m_pad * k_pad * x_bytes * grid_n
                        + k_pad * n_pad * w_bytes * grid_m
                        + n_pad * jnp.dtype(bias.dtype).itemsize
                        + m_pad * n_pad * out_bytes),
        transcendentals=0,
    )

    out = pl.pallas_call(
        _make_head_kernel,
        out_shape=jax.ShapeDtypeStruct((m_pad, n_pad), x.dtype),
        grid_spec=pltpu.PrefetchScalarGridSpec(
            num_scalar_prefetch=0,
            grid=(grid_m, grid_n, grid_k),
            in_specs=[
                pl.BlockSpec((tm_, tk_), lambda i, j, k: (i, k)),   # x tile
                _weight_spec(tk_, tn_, weight_bufs),                # weight tile
                pl.BlockSpec((1, tn_), lambda i, j, k: (0, j)),     # bias tile
            ],
            out_specs=pl.BlockSpec((tm_, tn_), lambda i, j, k: (i, j)),
            scratch_shapes=[pltpu.VMEM((tm_, tn_), jnp.float32)],
        ),
        compiler_params=pltpu.CompilerParams(
            dimension_semantics=("parallel", "parallel", "arbitrary"),
            vmem_limit_bytes=vmem_limit),
        cost_estimate=cost,
    )(x2, weight_t, b2)

    if (m_pad, n_pad) != (m, d_out):
        out = out[:m, :d_out]
    return out.reshape(lead + (num_heads, d_head))


if __name__ == "__main__":
    # Small shapes consistent with the module's forward.
    batch, seq = 2, 8
    d_model, d_head, num_heads = 32, 8, 4
    d_out = d_head * num_heads

    key = jax.random.PRNGKey(0)
    kx, kw, kb = jax.random.split(key, 3)

    # Deterministic parameter init (uniform, PyTorch-Linear-like bounds).
    bound = 1.0 / (d_model ** 0.5)
    weight = jax.random.uniform(kw, (d_out, d_model), jnp.float32, -bound, bound)
    bias = jax.random.uniform(kb, (d_out,), jnp.float32, -bound, bound)
    x = jax.random.normal(kx, (batch, seq, d_model), jnp.float32)

    # One-time parameter prep (load time), NOT per forward call.
    weight_t = jnp.asarray(weight.T)  # (d_model, d_out)

    # Plain-JAX reference (same math as torch Linear + view).
    y_ref = (x @ weight.T + bias).reshape(batch, seq, num_heads, d_head)

    # f32 path.
    y = make_head_forward(x, weight_t, bias, num_heads, d_head)
    y = jax.block_until_ready(y)
    assert y.shape == (batch, seq, num_heads, d_head)
    assert jnp.allclose(y, y_ref, atol=1e-5, rtol=1e-5)

    # bf16 fast path: bf16 operands on the MXU, f32 accumulation in-kernel.
    x_bf16 = x.astype(jnp.bfloat16)
    w_bf16 = weight_t.astype(jnp.bfloat16)
    y_bf16 = make_head_forward(x_bf16, w_bf16, bias, num_heads, d_head)
    y_bf16 = jax.block_until_ready(y_bf16)
    assert y_bf16.shape == (batch, seq, num_heads, d_head)
    assert jnp.allclose(y_bf16.astype(jnp.float32), y_ref, atol=5e-2, rtol=5e-2)

    # Ragged-M path (exercises the zero-pad + slice wrapper logic).
    x_rag = jax.random.normal(kx, (3, 5, d_model), jnp.float32)
    y_rag = make_head_forward(x_rag, weight_t, bias, num_heads, d_head)
    y_rag = jax.block_until_ready(y_rag)
    y_rag_ref = (x_rag @ weight.T + bias).reshape(3, 5, num_heads, d_head)
    assert jnp.allclose(y_rag, y_rag_ref, atol=1e-5, rtol=1e-5)

    print("KERNEL_OK")
</pallas_src>

<mosaic_0001>
module attributes {stable_mosaic.version = 11 : i64} {
  func.func @_make_head_kernel(%arg0: i32, %arg1: i32, %arg2: i32, %arg3: memref<16x32xf32, #tpu.memory_space<vmem>>, %arg4: memref<32x32xf32, #tpu.memory_space<vmem>>, %arg5: memref<1x32xf32, #tpu.memory_space<vmem>>, %arg6: memref<16x32xf32, #tpu.memory_space<vmem>>, %arg7: memref<16x32xf32, #tpu.memory_space<vmem>>) attributes {dimension_semantics = [#tpu.dimension_semantics<parallel>, #tpu.dimension_semantics<parallel>, #tpu.dimension_semantics<arbitrary>], iteration_bounds = array<i64: 1, 1, 1>, scalar_prefetch = 0 : i64, scratch_operands = 1 : i64, tpu.core_type = #tpu.core_type<tc>, window_params = [{transform_indices = @transform_0, window_bounds = array<i64: 16, 32>}, {transform_indices = @transform_1, window_bounds = array<i64: 32, 32>}, {transform_indices = @transform_2, window_bounds = array<i64: 1, 32>}, {transform_indices = @transform_3, window_bounds = array<i64: 16, 32>}]} {
    %c0_i32 = arith.constant 0 : i32
    %0 = arith.cmpi eq, %arg2, %c0_i32 : i32
    %1 = arith.extui %0 : i1 to i32
    %c0_i32_0 = arith.constant 0 : i32
    %2 = arith.cmpi ne, %1, %c0_i32_0 : i32
    scf.if %2 {
      %cst_10 = arith.constant 0.000000e+00 : f32
      %12 = vector.broadcast %cst_10 : f32 to vector<16x32xf32>
      %c0_11 = arith.constant 0 : index
      %c0_12 = arith.constant 0 : index
      %13 = vector.load %arg7[%c0_11, %c0_12] : memref<16x32xf32, #tpu.memory_space<vmem>>, vector<16x32xf32>
      tpu.vector_store %arg7[%c0_11, %c0_12], %12 {strides = array<i32>} : memref<16x32xf32, #tpu.memory_space<vmem>>, vector<16x32xf32>,
    } else {
    }
    %c0 = arith.constant 0 : index
    %c0_1 = arith.constant 0 : index
    %3 = vector.load %arg7[%c0, %c0_1] : memref<16x32xf32, #tpu.memory_space<vmem>>, vector<16x32xf32>
    %c0_2 = arith.constant 0 : index
    %c0_3 = arith.constant 0 : index
    %4 = vector.load %arg3[%c0_2, %c0_3] : memref<16x32xf32, #tpu.memory_space<vmem>>, vector<16x32xf32>
    %c0_4 = arith.constant 0 : index
    %c0_5 = arith.constant 0 : index
    %5 = vector.load %arg4[%c0_4, %c0_5] : memref<32x32xf32, #tpu.memory_space<vmem>>, vector<32x32xf32>
    %cst = arith.constant dense<0.000000e+00> : vector<16x32xf32>
    %6 = tpu.matmul %4, %5, %cst {dimension_numbers = #tpu.dot_dimension_numbers<[1], [0], [0], [1], [0, 0, 1, 1], [], []>} : vector<16x32xf32>, vector<32x32xf32>, vector<16x32xf32> -> vector<16x32xf32>
    %7 = arith.addf %3, %6 : vector<16x32xf32>
    %c0_6 = arith.constant 0 : index
    %c0_7 = arith.constant 0 : index
    %8 = vector.load %arg7[%c0_6, %c0_7] : memref<16x32xf32, #tpu.memory_space<vmem>>, vector<16x32xf32>
    tpu.vector_store %arg7[%c0_6, %c0_7], %7 {strides = array<i32>} : memref<16x32xf32, #tpu.memory_space<vmem>>, vector<16x32xf32>,
    %c0_i32_8 = arith.constant 0 : i32
    %9 = arith.cmpi eq, %arg2, %c0_i32_8 : i32
    %10 = arith.extui %9 : i1 to i32
    %c0_i32_9 = arith.constant 0 : i32
    %11 = arith.cmpi ne, %10, %c0_i32_9 : i32
    scf.if %11 {
      %c0_10 = arith.constant 0 : index
      %c0_11 = arith.constant 0 : index
      %12 = vector.load %arg7[%c0_10, %c0_11] : memref<16x32xf32, #tpu.memory_space<vmem>>, vector<16x32xf32>
      %c0_12 = arith.constant 0 : index
      %c0_13 = arith.constant 0 : index
      %13 = vector.load %arg5[%c0_12, %c0_13] : memref<1x32xf32, #tpu.memory_space<vmem>>, vector<1x32xf32>
      %14 = vector.broadcast %13 : vector<1x32xf32> to vector<16x32xf32>
      %15 = arith.addf %12, %14 : vector<16x32xf32>
      %c0_14 = arith.constant 0 : index
      %c0_15 = arith.constant 0 : index
      %16 = vector.load %arg6[%c0_14, %c0_15] : memref<16x32xf32, #tpu.memory_space<vmem>>, vector<16x32xf32>
      tpu.vector_store %arg6[%c0_14, %c0_15], %15 {strides = array<i32>} : memref<16x32xf32, #tpu.memory_space<vmem>>, vector<16x32xf32>,
    } else {
    }
    return
  }
  func.func @transform_0(%arg0: i32, %arg1: i32, %arg2: i32) -> (i32, i32) {
    %c0_i32 = arith.constant 0 : i32
    return %arg0, %arg2 : i32, i32
  }
  func.func @transform_1(%arg0: i32, %arg1: i32, %arg2: i32) -> (i32, i32) {
    %c0_i32 = arith.constant 0 : i32
    return %arg2, %arg1 : i32, i32
  }
  func.func @transform_2(%arg0: i32, %arg1: i32, %arg2: i32) -> (i32, i32) {
    %c0_i32 = arith.constant 0 : i32
    %c0_i32_0 = arith.constant 0 : i32
    return %c0_i32, %arg1 : i32, i32
  }
  func.func @transform_3(%arg0: i32, %arg1: i32, %arg2: i32) -> (i32, i32) {
    %c0_i32 = arith.constant 0 : i32
    return %arg0, %arg1 : i32, i32
  }
}

</mosaic_0001>

<bundles_post_ra>
// kernel: tpu_custom_call.1
= control target key start
LH: loop header
LB: loop body
LE: loop exit
PB: predicated region body
PF: predicated region fallthrough
CT: control target
= control target key end

     0   :  { %8 = vsyncpa [#allocation4], 0  ;;  %s366_s0 = inlined_call_operand.hbm [shape: f32[16,32], index: 0, kind: input, shape index: {}]   ;;  %s367_s1 = inlined_call_operand.hbm [shape: f32[32,32], index: 1, kind: input, shape index: {}]   ;;  %s368_s2 = inlined_call_operand.vmem [shape: f32[1,32], index: 2, kind: input, shape index: {}]   ;;  %s369_s3 = inlined_call_operand.hbm [shape: f32[16,32], index: 3, kind: output, shape index: {}]  }
   0x1   :  { %9 = vsyncpa [#allocation7], 0 }
   0x2   :  { %10 = vsyncpa [#allocation5], 0  ;;  %s284_s12 = smov [#allocation3]   ;;  %s212_s16 = scalar_lea.hbm %s366_s0, 256 }
   0x3   :  { %s16_s13 = sshll.u32 %s284_s12, 4  ;;  %p213_p0 = scmp.ne.s32.totalorder %s366_s0, %s212_s16  ;;  %s17_s13 = int_to_ptr.vmem [resolvable:$true] %s16_s13 }
   0x4   :  { %p216_p1 = scmp.lt.u32.totalorder %s212_s16, %s366_s0 }
   0x6   :  { %p218_p2 = pnand %p216_p1, %p213_p0 }
   0x8   :  { %221 = shalt.err (!%p218_p2)
}
   0x9   :  { %s222_s21 = scalar_lea.vmem %s17_s13, 256  ;;  %p227_p4 = scmp.lt.s32.totalorder %s17_s13, %s17_s13 }
   0xa   :  { %p223_p3 = scmp.ne.s32.totalorder %s17_s13, %s222_s21  ;;  %p228_p5 = scmp.lt.s32.totalorder %s222_s21, %s222_s21 }
   0xc   :  { %p229_p6 = por %p228_p5, %p227_p4 }
   0xe   :  { %p230_p7 = pnand %p229_p6, %p223_p3 }
  0x10   :  { %233 = shalt.err (!%p230_p7)
}
  0x11   :  { %s285_s22 = smov 128   ;;  %s286_s23 = smov 8  }
  0x12   :  { %22 = dma.hbm_to_vmem [thread:$0]  %s366_s0, 256, %s17_s13, [#allocation4], %s285_s22, %s285_s22, %s286_s23  }
  0x13   :  { %s287_s26 = smov [#allocation6]   ;;  %s234_s30 = scalar_lea.hbm %s367_s1, 512 }
  0x14   :  { %s28_s27 = sshll.u32 %s287_s26, 4  ;;  %p235_p8 = scmp.ne.s32.totalorder %s367_s1, %s234_s30  ;;  %s29_s27 = int_to_ptr.vmem [resolvable:$true] %s28_s27 }
  0x15   :  { %p238_p9 = scmp.lt.u32.totalorder %s234_s30, %s367_s1 }
  0x17   :  { %p240_p10 = pnand %p238_p9, %p235_p8 }
  0x19   :  { %243 = shalt.err (!%p240_p10)
}
  0x1a   :  { %s244_s8 = scalar_lea.vmem %s29_s27, 512  ;;  %p249_p12 = scmp.lt.s32.totalorder %s29_s27, %s29_s27 }
  0x1b   :  { %p245_p11 = scmp.ne.s32.totalorder %s29_s27, %s244_s8  ;;  %p250_p13 = scmp.lt.s32.totalorder %s244_s8, %s244_s8 }
  0x1d   :  { %p251_p0 = por %p250_p13, %p249_p12 }
  0x1f   :  { %p252_p1 = pnand %p251_p0, %p245_p11 }
  0x21   :  { %255 = shalt.err (!%p252_p1)
}
  0x22   :  { %34 = dma.hbm_to_vmem [thread:$0]  %s367_s1, 512, %s29_s27, [#allocation7], %s285_s22, %s285_s22, %s286_s23  }
  0x23   :  { %278 = dma.done.wait [#allocation4], 256  }
  0x24   :  { %279 = vsyncadd [#allocation4], 4294967040 }
  0x25   :  { %280 = dma.done.wait [#allocation7], 512  }
  0x26   :  { %281 = vsyncadd [#allocation7], 4294966784  ;;  %vm47_vm0 = vcmask 261120   ;;  %v288_v0 = vmov 0.0   ;;  %v54_v1 = vld [vmem:[#allocation6] sm:$0xff]  ;;  %v55_v2 = vld [vmem:[#allocation6 + $0x8] sm:$0xff] }
  0x27   :  { %49 = vst.msk [vmem:[#allocation2 + $0x8] sm:$0xff] %vm47_vm0, %v288_v0  ;;  %48 = vst.msk [vmem:[#allocation2] sm:$0xff] %vm47_vm0, %v288_v0  ;;  %v56_v3 = vld [vmem:[#allocation6 + $0x10] sm:$0xff]  ;;  %v198_v4 = vpack.c.bf16 %v55_v2, %v54_v1  ;;  %v57_v5 = vld [vmem:[#allocation6 + $0x18] sm:$0xff]  ;;  %s289_s11 = smov [#allocation8]  }
  0x28   :  { %v52_v6 = vld [vmem:[#allocation3] sm:$0xff]  ;;  %v202_v7 = vpack.c.bf16 %v57_v5, %v56_v3  ;;  %v53_v8 = vld [vmem:[#allocation3 + $0x8] sm:$0xff]  ;;  %v180_v15 = vld [vmem:[%s368_s2] ss:$0 sm:$0xff]  ;;  %s165_s12 = sshll.u32 %s289_s11, 4  ;;  %s166_s12 = int_to_ptr.vmem [resolvable:$true] %s165_s12 }
  0x29   :  { %195 = vmatprep.mubr.msk.f32.mxu0 %vm47_vm0, %v52_v6  ;;  %199 = vmatprep.subr.bf16.mxu0 %v198_v4  ;;  %s256_s13 = scalar_lea.vmem %s166_s12, 256  ;;  %p261_p3 = scmp.lt.s32.totalorder %s166_s12, %s166_s12 }
  0x2a   :  { %201 = vmatpush3.bf16.msra.mxu0 %v198_v4  ;;  %p257_p2 = scmp.ne.s32.totalorder %s166_s12, %s256_s13  ;;  %p262_p4 = scmp.lt.s32.totalorder %s256_s13, %s256_s13 }
  0x2b   :  { %203 = vmatprep.subr.bf16.mxu0 %v202_v7 }
  0x2c   :  { %p263_p5 = por %p262_p4, %p261_p3 }
  0x2e   :  { %205 = vmatpush3.bf16.msra.mxu0 %v202_v7  ;;  %v51_v9 = vld [vmem:[#allocation2 + $0x8] sm:$0xff]  ;;  %v50_v10 = vld [vmem:[#allocation2] sm:$0xff]  ;;  %p264_p6 = pnand %p263_p5, %p257_p2 }
  0x31   :  { %196 = vmatmul.mubr.msk.f32.vlgmr.msra.gmra.mrb[0].mxu0 %vm47_vm0, %v53_v8 }
 0x104   :  { %v197_v11 = vpop.f32.mrb[0].mxu0 }
 0x105   :  { %v141_v12 = vadd.f32 %v197_v11, %v51_v9  ;;  %v131_v13 = vpop.f32.mrb[1].mxu0 }
 0x106   :  { %v140_v14 = vadd.f32 %v131_v13, %v50_v10 }
 0x107   :  { %143 = vst.msk [vmem:[#allocation2 + $0x8] sm:$0xff] %vm47_vm0, %v141_v12 }
 0x108   :  { %142 = vst.msk [vmem:[#allocation2] sm:$0xff] %vm47_vm0, %v140_v14 }
 0x10e   :  { %v148_v16 = vld [vmem:[#allocation2 + $0x8] sm:$0xff] }
 0x10f   :  { %v147_v17 = vld [vmem:[#allocation2] sm:$0xff]  ;;  %v157_v18 = vadd.f32 %v180_v15, %v148_v16 }
 0x110   :  { %v156_v19 = vadd.f32 %v180_v15, %v147_v17 }
 0x111   :  { %159 = vst.msk [vmem:[#allocation8 + $0x8] sm:$0xff] %vm47_vm0, %v157_v18 }
 0x112   :  { %158 = vst.msk [vmem:[#allocation8] sm:$0xff] %vm47_vm0, %v156_v19 }
 0x113   :  { %267 = shalt.err (!%p264_p6)
}
 0x114   :  { %s268_s15 = scalar_lea.hbm %s369_s3, 256 }
 0x115   :  { %p269_p7 = scmp.ne.s32.totalorder %s369_s3, %s268_s15  ;;  %p272_p8 = scmp.lt.u32.totalorder %s268_s15, %s369_s3 }
 0x117   :  { %p274_p9 = pnand %p272_p8, %p269_p7 }
 0x119   :  { %277 = shalt.err (!%p274_p9)
}
 0x11a   :  { %171 = dma.vmem_to_hbm [thread:$0]  %s166_s12, 256, %s369_s3, [#allocation5], %s285_s22, %s285_s22, %s286_s23  }
 0x11b   :  { %282 = dma.done.wait [#allocation5], 256  }
 0x11c   :  { %283 = vsyncadd [#allocation5], 4294967040 }
 0x11d   :  { %175 = vsyncpa [#allocation4], 1 }
 0x11e   :  { %176 = vsyncpa [#allocation7], 1 }
 0x11f   :  { %177 = vsyncpa [#allocation5], 1 }

</bundles_post_ra>
